<compile_context>
chip_gen: v7x
topology: tpu7x:2x2x1
jax: 0.10.0
libtpu: 0.0.40
codegen_flags: <defaults>
</compile_context>

<pallas_src>
import jax
import jax.numpy as jnp
from jax.experimental import pallas as pl
from jax.experimental.pallas import tpu as pltpu

_LANE = 128
_MIN_PALLAS_BYTES = 512 * 1024        # below this, plain XLA elementwise wins
_MIN_GRID_BLOCKS = 8                  # >= ~4 pipelined steps per v7x TensorCore


def _relu_kernel(x_ref, o_ref):
    # Pure VPU elementwise max(x, 0); no zeros tile materialized.
    o_ref[...] = jnp.maximum(x_ref[...], 0)


def _sublane(dtype) -> int:
    # Native packed sublane tile: 8 rows for 4-byte, 16 for bf16, 32 for int8/fp8.
    return max(8, 32 // jnp.dtype(dtype).itemsize)


def _memory_budget():
    """(tile_target_bytes, vmem_limit_cap_bytes), generation-aware."""
    vmem = 64 * 1024 * 1024  # conservative default = v7x-sized VMEM
    try:
        info = pltpu.get_tpu_info()
        vmem = int(getattr(info, "vmem_capacity_bytes", vmem))
    except Exception:
        pass
    if vmem >= 96 * 1024 * 1024:
        # v5e / v6e: 128 MiB VMEM -> bigger tiles, fewer grid steps.
        return 16 * 1024 * 1024, 96 * 1024 * 1024
    # v7x: 64 MiB VMEM.  ~8 MiB tiles amortize the ~0.35us per-step overhead
    # against ~3.2 TB/s HBM while 2x(in+out) double-buffers fit comfortably.
    return 8 * 1024 * 1024, 48 * 1024 * 1024


def _pick_2d_layout(x):
    """Lane-dense 2D (rows, cols) view of the flattened array, or None.

    Pure reshape (contiguous flatten, no data movement).  Returns None when the
    flat size is not a multiple of 128; the caller then splits off the tail.
    """
    n = x.size
    for w in (2048, 1024, 512, 256):
        if n % w == 0 and n // w >= 8:
            return x.reshape(n // w, w)
    if n % _LANE == 0:
        return x.reshape(n // _LANE, _LANE)
    return None


def _relu_pallas_2d(x2, *, donate):
    """Run the 1-D-row-grid Pallas ReLU on a lane-dense 2D array."""
    R, C = x2.shape
    itemsize = jnp.dtype(x2.dtype).itemsize
    sub = _sublane(x2.dtype)
    row_bytes = C * itemsize
    tile_target, vmem_cap = _memory_budget()

    # Rows per tile: aim at the generation's tile target, sublane aligned.
    tile_rows = (tile_target // max(row_bytes, 1)) // sub * sub
    tile_rows = max(sub, tile_rows)
    if tile_rows >= R:
        tile_rows = R  # single full-height block is always a legal block shape
    # Guarantee several grid steps when the array is large enough, so input
    # prefetch / compute / output writeback overlap across iterations and both
    # v7x TensorCores get work.  Costs nothing on single-core v5e/v6e.
    if R >= _MIN_GRID_BLOCKS * sub and pl.cdiv(R, tile_rows) < _MIN_GRID_BLOCKS:
        per = pl.cdiv(R, _MIN_GRID_BLOCKS)
        tile_rows = max(sub, ((per + sub - 1) // sub) * sub)

    tile_bytes = tile_rows * C * itemsize
    grid_rows = pl.cdiv(R, tile_rows)  # ragged last block -> masked writeback
    vmem_limit = int(min(vmem_cap,
                         max(16 * 1024 * 1024, 4 * tile_bytes + 4 * 1024 * 1024)))

    # TODO(synk): sweep pipeline_mode=pl.Buffered(3) on the input BlockSpec on
    # v7x once the tile size is settled (expected low-single-digit % there).
    return pl.pallas_call(
        _relu_kernel,
        out_shape=jax.ShapeDtypeStruct((R, C), x2.dtype),
        grid_spec=pltpu.PrefetchScalarGridSpec(
            num_scalar_prefetch=0,
            grid=(grid_rows,),
            in_specs=[pl.BlockSpec((tile_rows, C), lambda i: (i, 0))],
            out_specs=pl.BlockSpec((tile_rows, C), lambda i: (i, 0)),
        ),
        compiler_params=pltpu.CompilerParams(
            dimension_semantics=("parallel",),
            vmem_limit_bytes=vmem_limit,
        ),
        # Only alias when the caller explicitly donates x; an unconditional
        # alias forces XLA to insert a defensive full-size copy whenever the
        # input buffer is still live, roughly halving effective bandwidth.
        input_output_aliases={0: 0} if donate else {},
    )(x2)


def my_relu(x, *, donate=False, force_pallas=False):
    """Pallas TPU equivalent of torch.nn.functional.relu(x). Any shape/dtype.

    donate=True additionally aliases the input HBM buffer to the output; only
    use it when x is dead after this call (e.g. a donated jit argument).
    """
    if x.ndim == 0 or x.size == 0:
        return jnp.maximum(x, 0)  # degenerate: nothing worth launching a kernel for
    if not force_pallas and x.size * jnp.dtype(x.dtype).itemsize < _MIN_PALLAS_BYTES:
        # Launch + pipeline-prologue overhead dwarfs the work; let XLA fuse it.
        return jnp.maximum(x, 0)

    orig_shape = x.shape
    x2 = _pick_2d_layout(x)
    if x2 is not None:
        return _relu_pallas_2d(x2, donate=donate).reshape(orig_shape)

    # Flat size not a multiple of 128: keep the lane-dense fast path for the
    # bulk and handle the <128-element tail with a tiny XLA op, instead of
    # masked vst.msk partial stores on every row of the main kernel.
    n = x.size
    n_main = (n // _LANE) * _LANE
    if n_main == 0:
        return jnp.maximum(x, 0)
    flat = x.reshape(n)
    head = _relu_pallas_2d(flat[:n_main].reshape(n_main // _LANE, _LANE),
                           donate=False)
    tail = jnp.maximum(flat[n_main:], 0)
    return jnp.concatenate([head.reshape(n_main), tail]).reshape(orig_shape)


if __name__ == "__main__":
    key = jax.random.PRNGKey(0)

    # Small NCHW-like input consistent with forward(x): (2, 4, 16, 16)
    x = jax.random.normal(key, (2, 4, 16, 16), dtype=jnp.float32)
    ref = jnp.maximum(x, 0.0)
    y = jax.block_until_ready(my_relu(x, force_pallas=True))
    assert y.shape == x.shape and y.dtype == x.dtype
    assert jnp.array_equal(y, ref), "mismatch vs reference ReLU"

    k1, k2, k3 = jax.random.split(key, 3)

    # Coverage: ragged row grid (masked boundary block) on the lane-dense path.
    x_b = jax.random.normal(k1, (4, 3, 64, 129), dtype=jnp.float32)
    ref_b = jnp.maximum(x_b, 0.0)
    y_b = jax.block_until_ready(my_relu(x_b, force_pallas=True))
    assert jnp.array_equal(y_b, ref_b)

    # Coverage: bf16, flat size NOT a multiple of 128 -> lane-dense head + tiny tail.
    x_c = jax.random.normal(k2, (2, 5, 7, 11)).astype(jnp.bfloat16)
    ref_c = jnp.maximum(x_c, jnp.bfloat16(0))
    y_c = jax.block_until_ready(my_relu(x_c, force_pallas=True))
    assert y_c.dtype == x_c.dtype
    assert jnp.array_equal(y_c, ref_c)

    # Coverage: opt-in donation path (reference computed before the call).
    x_d = jax.random.normal(k3, (256, 1024), dtype=jnp.float32)
    ref_d = jnp.maximum(x_d, 0.0)
    y_d = jax.block_until_ready(my_relu(x_d, donate=True, force_pallas=True))
    assert jnp.array_equal(y_d, ref_d)

    print("KERNEL_OK")
</pallas_src>

<mosaic_0001>
module attributes {stable_mosaic.version = 11 : i64} {
  func.func @_relu_kernel(%arg0: i32, %arg1: memref<8x256xf32, #tpu.memory_space<vmem>>, %arg2: memref<8x256xf32, #tpu.memory_space<vmem>>) attributes {dimension_semantics = [#tpu.dimension_semantics<parallel>], iteration_bounds = array<i64: 1>, scalar_prefetch = 0 : i64, scratch_operands = 0 : i64, tpu.core_type = #tpu.core_type<tc>, window_params = [{transform_indices = @transform_0, window_bounds = array<i64: 8, 256>}, {transform_indices = @transform_1, window_bounds = array<i64: 8, 256>}]} {
    %c0 = arith.constant 0 : index
    %c0_0 = arith.constant 0 : index
    %0 = vector.load %arg1[%c0, %c0_0] : memref<8x256xf32, #tpu.memory_space<vmem>>, vector<8x256xf32>
    %cst = arith.constant 0.000000e+00 : f32
    %1 = vector.broadcast %cst : f32 to vector<8x256xf32>
    %2 = arith.maximumf %0, %1 : vector<8x256xf32>
    %c0_1 = arith.constant 0 : index
    %c0_2 = arith.constant 0 : index
    %3 = vector.load %arg2[%c0_1, %c0_2] : memref<8x256xf32, #tpu.memory_space<vmem>>, vector<8x256xf32>
    tpu.vector_store %arg2[%c0_1, %c0_2], %2 {strides = array<i32>} : memref<8x256xf32, #tpu.memory_space<vmem>>, vector<8x256xf32>,
    return
  }
  func.func @transform_0(%arg0: i32) -> (i32, i32) {
    %c0_i32 = arith.constant 0 : i32
    %c0_i32_0 = arith.constant 0 : i32
    return %arg0, %c0_i32 : i32, i32
  }
  func.func @transform_1(%arg0: i32) -> (i32, i32) {
    %c0_i32 = arith.constant 0 : i32
    %c0_i32_0 = arith.constant 0 : i32
    return %arg0, %c0_i32 : i32, i32
  }
}

</mosaic_0001>

<bundles_post_ra>
// kernel: tpu_custom_call.1
= control target key start
LH: loop header
LB: loop body
LE: loop exit
PB: predicated region body
PF: predicated region fallthrough
CT: control target
= control target key end

     0   :  { %6 = vsyncpa [#allocation3], 0  ;;  %s128_s0 = inlined_call_operand.hbm [shape: f32[8,256], index: 0, kind: input, shape index: {}]   ;;  %s129_s1 = inlined_call_operand.hbm [shape: f32[8,256], index: 1, kind: output, shape index: {}]  }
   0x1   :  { %7 = vsyncpa [#allocation4], 0  ;;  %s92_s6 = smov [#allocation2]   ;;  %s44_s10 = scalar_lea.hbm %s128_s0, 256 }
   0x2   :  { %s14_s7 = sshll.u32 %s92_s6, 4  ;;  %p45_p0 = scmp.ne.s32.totalorder %s128_s0, %s44_s10  ;;  %s15_s7 = int_to_ptr.vmem [resolvable:$true] %s14_s7 }
   0x3   :  { %p48_p1 = scmp.lt.u32.totalorder %s44_s10, %s128_s0 }
   0x5   :  { %p50_p2 = pnand %p48_p1, %p45_p0 }
   0x7   :  { %53 = shalt.err (!%p50_p2)
}
   0x8   :  { %s54_s15 = scalar_lea.vmem %s15_s7, 256  ;;  %p59_p4 = scmp.lt.s32.totalorder %s15_s7, %s15_s7 }
   0x9   :  { %p55_p3 = scmp.ne.s32.totalorder %s15_s7, %s54_s15  ;;  %p60_p5 = scmp.lt.s32.totalorder %s54_s15, %s54_s15 }
   0xb   :  { %p61_p6 = por %p60_p5, %p59_p4 }
   0xd   :  { %p62_p7 = pnand %p61_p6, %p55_p3 }
   0xf   :  { %65 = shalt.err (!%p62_p7)
}
  0x10   :  { %17 = dma.hbm_to_vmem [thread:$0]  %s128_s0, 256, %s15_s7, [#allocation3]  }
  0x11   :  { %88 = dma.done.wait [#allocation3], 256  }
  0x12   :  { %89 = vsyncadd [#allocation3], 4294967040  ;;  %s93_s18 = smov [#allocation5]   ;;  %v21_v0 = vld [vmem:[#allocation2] sm:$0xff]  ;;  %v22_v1 = vld [vmem:[#allocation2 + $0x8] sm:$0xff] }
  0x13   :  { %s33_s19 = sshll.u32 %s93_s18, 4  ;;  %v23_v2 = vmax.f32 %v21_v0, 0.0  ;;  %v24_v3 = vmax.f32 %v22_v1, 0.0  ;;  %s34_s19 = int_to_ptr.vmem [resolvable:$true] %s33_s19 }
  0x14   :  { %s66_s20 = scalar_lea.vmem %s34_s19, 256  ;;  %p71_p9 = scmp.lt.s32.totalorder %s34_s19, %s34_s19 }
  0x15   :  { %25 = vst [vmem:[#allocation5] sm:$0xff] %v23_v2  ;;  %26 = vst [vmem:[#allocation5 + $0x8] sm:$0xff] %v24_v3  ;;  %p67_p8 = scmp.ne.s32.totalorder %s34_s19, %s66_s20  ;;  %p72_p10 = scmp.lt.s32.totalorder %s66_s20, %s66_s20 }
  0x17   :  { %p73_p11 = por %p72_p10, %p71_p9 }
  0x19   :  { %p74_p12 = pnand %p73_p11, %p67_p8 }
  0x1b   :  { %77 = shalt.err (!%p74_p12)
}
  0x1c   :  { %s78_s22 = scalar_lea.hbm %s129_s1, 256 }
  0x1d   :  { %p79_p13 = scmp.ne.s32.totalorder %s129_s1, %s78_s22  ;;  %p82_p0 = scmp.lt.u32.totalorder %s78_s22, %s129_s1 }
  0x1f   :  { %p84_p1 = pnand %p82_p0, %p79_p13 }
  0x21   :  { %87 = shalt.err (!%p84_p1)
}
  0x22   :  { %36 = dma.vmem_to_hbm [thread:$0]  %s34_s19, 256, %s129_s1, [#allocation4]  }
  0x23   :  { %90 = dma.done.wait [#allocation4], 256  }
  0x24   :  { %91 = vsyncadd [#allocation4], 4294967040 }
  0x25   :  { %40 = vsyncpa [#allocation3], 1 }
  0x26   :  { %41 = vsyncpa [#allocation4], 1 }

</bundles_post_ra>
